<compile_context>
chip_gen: v6e
topology: v6e:2x2x1
jax: 0.10.0
libtpu: 0.0.40
codegen_flags: <defaults>
</compile_context>

<pallas_src>
import functools

import jax
import jax.numpy as jnp
from jax.experimental import pallas as pl
from jax.experimental.pallas import tpu as pltpu


def _coral_loss_kernel(labels_ref, logits_ref, out_ref, acc_ref, *, n_total, inv_n):
    """One grid step over a lane-dense (K, TN) tile.

    labels_ref: (1, TN)  int32 VMEM
    logits_ref: (K, TN)  native-dtype VMEM
    out_ref:    (1, 1)   f32 SMEM output (scalar loss)
    acc_ref:    (1,)     f32 SMEM scratch (running sum, persists across grid)
    """
    pid = pl.program_id(0)
    last = pl.num_programs(0) - 1
    tile_n = logits_ref.shape[1]

    @pl.when(pid == 0)
    def _():
        acc_ref[0] = jnp.float32(0.0)

    x = logits_ref[...].astype(jnp.float32)            # (K, TN)
    labels = labels_ref[...]                            # (1, TN) int32

    # Per-element NLL: softplus(x) - x * levels, with levels[k, n] = (k < label[n]).
    k_idx = jax.lax.broadcasted_iota(jnp.int32, x.shape, 0)
    softplus = jnp.maximum(x, 0.0) + jnp.log1p(jnp.exp(-jnp.abs(x)))
    contrib = softplus - jnp.where(k_idx < labels, x, 0.0)

    # Steady-state tiles are fully in-bounds -> unmasked reduce.
    @pl.when(pid != last)
    def _():
        acc_ref[0] += jnp.sum(contrib)

    # Last (possibly ragged) tile: mask out-of-bounds columns (unspecified DMA
    # padding), fold into the running sum and emit the mean.  This masking cost
    # is paid exactly once per kernel invocation.
    @pl.when(pid == last)
    def _():
        col = jax.lax.broadcasted_iota(jnp.int32, x.shape, 1) + pid * tile_n
        tail = jnp.sum(jnp.where(col < n_total, contrib, 0.0))
        out_ref[0, 0] = (acc_ref[0] + tail) * inv_n


def coral_loss_pallas(y_true_flat, logits, *, tile_n=None):
    """CORAL ordinal-regression loss (reduction='mean').

    y_true_flat: (N,) integer class labels in [0, num_classes)
    logits:      (N, K) float logits, K = num_classes - 1 (any float dtype)
    Returns a float32 scalar.
    """
    n, k = logits.shape

    if tile_n is None:
        # ~3 MiB of (logits + labels) per pipeline buffer, lane-aligned; with
        # double-buffering this stays well inside the default scoped-VMEM limit.
        bytes_per_col = k * jnp.dtype(logits.dtype).itemsize + 4
        tile_n = max(128, ((3 * 1024 * 1024) // bytes_per_col) // 128 * 128)
    tile_n = int(min(max(128, (tile_n // 128) * 128), pl.cdiv(n, 128) * 128))
    grid = pl.cdiv(n, tile_n)   # ragged last block handled in-kernel

    labels_2d = y_true_flat.astype(jnp.int32).reshape(1, n)   # (1, N)
    logits_t = logits.T                                        # (K, N), native dtype

    kernel = functools.partial(_coral_loss_kernel, n_total=n, inv_n=float(1.0 / n))

    out = pl.pallas_call(
        kernel,
        out_shape=jax.ShapeDtypeStruct((1, 1), jnp.float32),
        grid_spec=pltpu.PrefetchScalarGridSpec(
            num_scalar_prefetch=0,
            grid=(grid,),
            in_specs=[
                pl.BlockSpec((1, tile_n), lambda i: (0, i)),   # labels (1, TN)
                pl.BlockSpec((k, tile_n), lambda i: (0, i)),   # logits (K, TN)
            ],
            out_specs=pl.BlockSpec((1, 1), lambda i: (0, 0),
                                   memory_space=pltpu.SMEM),
            scratch_shapes=[pltpu.SMEM((1,), jnp.float32)],
        ),
        compiler_params=pltpu.CompilerParams(
            dimension_semantics=("arbitrary",)),
    )(labels_2d, logits_t)
    return out[0, 0]


def coral_loss_reference(y_true_flat, logits):
    """Pure-JAX reference mirroring coral_pytorch.losses.coral_loss (mean)."""
    k = logits.shape[1]
    levels = (jnp.arange(k)[None, :] < y_true_flat[:, None]).astype(jnp.float32)
    logsig = jax.nn.log_sigmoid(logits)
    term = logsig * levels + (logsig - logits) * (1.0 - levels)
    return jnp.mean(-jnp.sum(term, axis=1))


if __name__ == "__main__":
    key = jax.random.PRNGKey(0)
    k_lab, k_log, k_lab2, k_log2 = jax.random.split(key, 4)

    # Shapes implied by the module's forward: y_true (2, 4) -> .view(-1) -> N = 8,
    # y_pred.logits (8, num_classes - 1).
    num_classes = 5
    batch, seq = 2, 4
    N, K = batch * seq, num_classes - 1

    y_true = jax.random.randint(k_lab, (batch, seq), 0, num_classes, dtype=jnp.int32)
    logits = jax.random.normal(k_log, (N, K), dtype=jnp.float32)

    loss = jax.block_until_ready(coral_loss_pallas(y_true.reshape(-1), logits))
    ref = coral_loss_reference(y_true.reshape(-1), logits)
    assert jnp.allclose(loss, ref, atol=1e-5, rtol=1e-5), (loss, ref)

    # Larger ragged bf16 case: single partially-masked tile + in-kernel cast path.
    N2, C2 = 1000, 7
    y2 = jax.random.randint(k_lab2, (N2,), 0, C2, dtype=jnp.int32)
    x2 = jax.random.normal(k_log2, (N2, C2 - 1), dtype=jnp.bfloat16)
    loss2 = jax.block_until_ready(coral_loss_pallas(y2, x2))
    ref2 = coral_loss_reference(y2, x2.astype(jnp.float32))
    assert jnp.allclose(loss2, ref2, atol=1e-4, rtol=1e-4), (loss2, ref2)

    # Same data with a small forced tile: multi-step grid exercising the SMEM
    # accumulator carry and the ragged-last-tile masking path.
    loss3 = jax.block_until_ready(coral_loss_pallas(y2, x2, tile_n=256))
    assert jnp.allclose(loss3, ref2, atol=1e-4, rtol=1e-4), (loss3, ref2)

    print("KERNEL_OK")
</pallas_src>

<mosaic_0001>
module attributes {stable_mosaic.version = 11 : i64} {
  func.func @_coral_loss_kernel(%arg0: i32, %arg1: memref<1x128xi32, #tpu.memory_space<vmem>>, %arg2: memref<4x128xf32, #tpu.memory_space<vmem>>, %arg3: memref<1x1xf32, #tpu.memory_space<smem>>, %arg4: memref<1xf32, #tpu.memory_space<smem>>) attributes {dimension_semantics = [#tpu.dimension_semantics<arbitrary>], iteration_bounds = array<i64: 1>, scalar_prefetch = 0 : i64, scratch_operands = 1 : i64, tpu.core_type = #tpu.core_type<tc>, window_params = [{transform_indices = @transform_0, window_bounds = array<i64: 1, 128>}, {transform_indices = @transform_1, window_bounds = array<i64: 4, 128>}, {transform_indices = @transform_2, window_bounds = array<i64: 1, 1>}]} {
    %c0_i32 = arith.constant 0 : i32
    %0 = arith.cmpi eq, %arg0, %c0_i32 : i32
    %1 = arith.extui %0 : i1 to i32
    %c0_i32_0 = arith.constant 0 : i32
    %2 = arith.cmpi ne, %1, %c0_i32_0 : i32
    scf.if %2 {
      %cst_10 = arith.constant 0.000000e+00 : f32
      %c0_11 = arith.constant 0 : index
      %25 = memref.load %arg4[%c0_11] : memref<1xf32, #tpu.memory_space<smem>>
      memref.store %cst_10, %arg4[%c0_11] : memref<1xf32, #tpu.memory_space<smem>>
    } else {
    }
    %c0 = arith.constant 0 : index
    %c0_1 = arith.constant 0 : index
    %3 = vector.load %arg2[%c0, %c0_1] : memref<4x128xf32, #tpu.memory_space<vmem>>, vector<4x128xf32>
    %c0_2 = arith.constant 0 : index
    %c0_3 = arith.constant 0 : index
    %4 = vector.load %arg1[%c0_2, %c0_3] : memref<1x128xi32, #tpu.memory_space<vmem>>, vector<1x128xi32>
    %5 = tpu.iota {dimensions = array<i32: 0>} : vector<4x128xi32>
    %cst = arith.constant 0.000000e+00 : f32
    %6 = vector.broadcast %cst : f32 to vector<4x128xf32>
    %7 = arith.maximumf %3, %6 : vector<4x128xf32>
    %8 = math.absf %3 : vector<4x128xf32>
    %cst_4 = arith.constant 0.000000e+00 : f32
    %9 = vector.broadcast %cst_4 : f32 to vector<4x128xf32>
    %10 = arith.subf %9, %8 : vector<4x128xf32>
    %11 = math.exp %10 : vector<4x128xf32>
    %12 = math.log1p %11 : vector<4x128xf32>
    %13 = arith.addf %7, %12 : vector<4x128xf32>
    %14 = vector.broadcast %4 : vector<1x128xi32> to vector<4x128xi32>
    %15 = arith.cmpi slt, %5, %14 : vector<4x128xi32>
    %cst_5 = arith.constant 0.000000e+00 : f32
    %16 = vector.broadcast %cst_5 : f32 to vector<4x128xf32>
    %17 = arith.select %15, %3, %16 : vector<4x128xi1>, vector<4x128xf32>
    %18 = arith.subf %13, %17 : vector<4x128xf32>
    %c0_i32_6 = arith.constant 0 : i32
    %19 = arith.cmpi ne, %arg0, %c0_i32_6 : i32
    %20 = arith.extui %19 : i1 to i32
    %c0_i32_7 = arith.constant 0 : i32
    %21 = arith.cmpi ne, %20, %c0_i32_7 : i32
    scf.if %21 {
      %c0_10 = arith.constant 0 : index
      %25 = memref.load %arg4[%c0_10] : memref<1xf32, #tpu.memory_space<smem>>
      %26 = vector.shape_cast %18 : vector<4x128xf32> to vector<1x4x128xf32>
      %cst_11 = arith.constant dense<0.000000e+00> : vector<1xf32>
      %27 = vector.multi_reduction <add>, %26, %cst_11 [1, 2] : vector<1x4x128xf32> to vector<1xf32>
      %28 = vector.shape_cast %27 : vector<1xf32> to vector<1x1x1xf32>
      %29 = vector.extract %28[0, 0, 0] : f32 from vector<1x1x1xf32>
      %30 = arith.addf %25, %29 : f32
      %c0_12 = arith.constant 0 : index
      %31 = memref.load %arg4[%c0_12] : memref<1xf32, #tpu.memory_space<smem>>
      memref.store %30, %arg4[%c0_12] : memref<1xf32, #tpu.memory_space<smem>>
    } else {
    }
    %c0_i32_8 = arith.constant 0 : i32
    %22 = arith.cmpi eq, %arg0, %c0_i32_8 : i32
    %23 = arith.extui %22 : i1 to i32
    %c0_i32_9 = arith.constant 0 : i32
    %24 = arith.cmpi ne, %23, %c0_i32_9 : i32
    scf.if %24 {
      %25 = tpu.iota {dimensions = array<i32: 1>} : vector<4x128xi32>
      %c128_i32 = arith.constant 128 : i32
      %26 = arith.muli %arg0, %c128_i32 : i32
      %27 = vector.broadcast %26 : i32 to vector<4x128xi32>
      %28 = arith.addi %25, %27 : vector<4x128xi32>
      %c8_i32 = arith.constant 8 : i32
      %29 = vector.broadcast %c8_i32 : i32 to vector<4x128xi32>
      %30 = arith.cmpi slt, %28, %29 : vector<4x128xi32>
      %cst_10 = arith.constant 0.000000e+00 : f32
      %31 = vector.broadcast %cst_10 : f32 to vector<4x128xf32>
      %32 = arith.select %30, %18, %31 : vector<4x128xi1>, vector<4x128xf32>
      %33 = vector.shape_cast %32 : vector<4x128xf32> to vector<1x4x128xf32>
      %cst_11 = arith.constant dense<0.000000e+00> : vector<1xf32>
      %34 = vector.multi_reduction <add>, %33, %cst_11 [1, 2] : vector<1x4x128xf32> to vector<1xf32>
      %35 = vector.shape_cast %34 : vector<1xf32> to vector<1x1x1xf32>
      %36 = vector.extract %35[0, 0, 0] : f32 from vector<1x1x1xf32>
      %c0_12 = arith.constant 0 : index
      %37 = memref.load %arg4[%c0_12] : memref<1xf32, #tpu.memory_space<smem>>
      %38 = arith.addf %37, %36 : f32
      %cst_13 = arith.constant 1.250000e-01 : f32
      %39 = arith.mulf %38, %cst_13 : f32
      %c0_14 = arith.constant 0 : index
      %c0_15 = arith.constant 0 : index
      %40 = memref.load %arg3[%c0_14, %c0_15] : memref<1x1xf32, #tpu.memory_space<smem>>
      memref.store %39, %arg3[%c0_14, %c0_15] : memref<1x1xf32, #tpu.memory_space<smem>>
    } else {
    }
    return
  }
  func.func @transform_0(%arg0: i32) -> (i32, i32) {
    %c0_i32 = arith.constant 0 : i32
    %c0_i32_0 = arith.constant 0 : i32
    return %c0_i32, %arg0 : i32, i32
  }
  func.func @transform_1(%arg0: i32) -> (i32, i32) {
    %c0_i32 = arith.constant 0 : i32
    %c0_i32_0 = arith.constant 0 : i32
    return %c0_i32, %arg0 : i32, i32
  }
  func.func @transform_2(%arg0: i32) -> (i32, i32) {
    %c0_i32 = arith.constant 0 : i32
    %c0_i32_0 = arith.constant 0 : i32
    %c0_i32_1 = arith.constant 0 : i32
    return %c0_i32, %c0_i32_0 : i32, i32
  }
}

</mosaic_0001>

<bundles_post_ra>
// kernel: tpu_custom_call.1
= control target key start
LH: loop header
LB: loop body
LE: loop exit
PB: predicated region body
PF: predicated region fallthrough
CT: control target
= control target key end

     0   :  { %7 = vsyncpa [#allocation4], 0  ;;  %s219_s0 = inlined_call_operand.hbm [shape: s32[1,8], index: 0, kind: input, shape index: {}]   ;;  %s220_s1 = inlined_call_operand.hbm [shape: f32[4,8], index: 1, kind: input, shape index: {}]   ;;  %s221_s2 = inlined_call_operand.hbm [shape: f32[1,1], index: 2, kind: output, shape index: {}]  }
   0x1   :  { %8 = vsyncpa [#allocation7], 0 }
   0x2   :  { %9 = vsyncpa [#allocation5], 0  ;;  %s192_s9 = smov [#allocation3]   ;;  %s193_s11 = smov [#allocation6]  }
   0x3   :  { %s16_s10 = sshll.u32 %s192_s9, 4  ;;  %s26_s12 = sshll.u32 %s193_s11, 4  ;;  %s17_s10 = int_to_ptr.vmem [resolvable:$true] %s16_s10  ;;  %s27_s12 = int_to_ptr.vmem [resolvable:$true] %s26_s12 }
   0x4   :  { %s146_s13 = scalar_lea.vmem %s17_s10, 16  ;;  %s150_s14 = scalar_lea.vmem %s17_s10, 32 }
   0x5   :  { %p147_p0 = scmp.ne.s32.totalorder %s17_s10, %s146_s13  ;;  %p151_p1 = scmp.lt.s32.totalorder %s17_s10, %s17_s10 }
   0x6   :  { %p152_p2 = scmp.lt.s32.totalorder %s150_s14, %s146_s13 }
   0x8   :  { %p153_p3 = por %p152_p2, %p151_p1 }
   0xa   :  { %p154_p4 = pnand %p153_p3, %p147_p0 }
   0xc   :  { %157 = shalt.err (!%p154_p4)
}
   0xd   :  { %19 = dma.hbm_to_vmem [thread:$0]  %s219_s0, 16, %s17_s10, [#allocation4]  }
   0xe   :  { %s166_s17 = scalar_lea.vmem %s27_s12, 64  ;;  %p171_p6 = scmp.lt.s32.totalorder %s27_s12, %s27_s12 }
   0xf   :  { %p167_p5 = scmp.ne.s32.totalorder %s27_s12, %s166_s17  ;;  %p172_p7 = scmp.lt.s32.totalorder %s166_s17, %s166_s17 }
  0x11   :  { %p173_p8 = por %p172_p7, %p171_p6 }
  0x13   :  { %p174_p9 = pnand %p173_p8, %p167_p5 }
  0x15   :  { %177 = shalt.err (!%p174_p9)
}
  0x16   :  { %29 = dma.hbm_to_vmem [thread:$0]  %s220_s1, 64, %s27_s12, [#allocation7]  }
  0x17   :  { %186 = dma.done.wait [#allocation4], 16  }
  0x18   :  { %187 = vsyncadd [#allocation4], 4294967280 }
  0x19   :  { %188 = dma.done.wait [#allocation7], 64  }
  0x1a   :  { %189 = vsyncadd [#allocation7], 4294967232  ;;  %v42_v0 = vld [vmem:[#allocation6] sm:$0xf]  ;;  %v44_v7 = vlaneseq  ;;  %v128_v11 = vld [vmem:[#allocation3] ss:$0 sm:$0xff] }
  0x1b   :  { %v47_v1 = vand.u32 2147483647, %v42_v0  ;;  %v46_v14 = vmax.f32 %v42_v0, 0.0  ;;  %vm97_vm3 = vcmask 1043456   ;;  %s194_s20 = smov [#allocation8]  }
  0x1c   :  { %v45_v9 = vshrl.u32 %v44_v7, 7  ;;  %v91_v16 = vand.u32 127, %v44_v7 }
  0x1d   :  { %v48_v2 = vsub.f32 0.0, %v47_v1 }
  0x1e   :  { %vm65_vm1 = vcmp.lt.s32.totalorder %v45_v9, %v128_v11  ;;  %vm95_vm2 = vcmp.lt.s32.totalorder %v91_v16, 8 }
  0x1f   :  { %v49_v3 = vmul.f32 1.442695, %v48_v2  ;;  %v66_v18 = vsel %vm65_vm1, %v42_v0, 0.0 }
  0x21   :  { %134 = vpow2.f32 %v49_v3 }
  0x2e   :  { %v135_v4 = vpop.eup %134 }
  0x2f   :  { %v51_v5 = vadd.f32 1.0, %v135_v4  ;;  %v54_v6 = vmul.f32 -0.5, %v135_v4  ;;  %v57_v10 = vand.u32 2147483647, %v135_v4 }
  0x31   :  { %136 = vlog2.f32 %v51_v5  ;;  %v55_v8 = vadd.f32 1.0, %v54_v6  ;;  %vm58_vm0 = vcmp.lt.f32.partialorder %v57_v10, 0.0004427343 }
  0x33   :  { %v56_v12 = vmul.f32 %v135_v4, %v55_v8 }
  0x3e   :  { %v137_v13 = vpop.eup %136 }
  0x3f   :  { %v53_v15 = vmul.f32 0.6931472, %v137_v13 }
  0x41   :  { %v59_v17 = vsel %vm58_vm0, %v56_v12, %v53_v15 }
  0x42   :  { %v60_v19 = vadd.f32 %v59_v17, %v46_v14 }
  0x44   :  { %v67_v20 = vsub.f32 %v60_v19, %v66_v18 }
  0x46   :  { %v96_v21 = vsel %vm95_vm2, %v67_v20, 0.0 }
  0x47   :  { %v98_v22 = vsel %vm97_vm3, %v96_v21, 0.0 }
  0x48   :  { %99 = vadd.xlane.f32.xlu0 %v98_v22 }
  0xd1   :  { %v100_v23 = vpop.xlane.xlu0 %99 }
  0xd2   :  { %v101_v24 = vrot.slane %v100_v23, 4 }
  0xd4   :  { %v102_v25 = vadd.f32 %v101_v24, %v100_v23 }
  0xd6   :  { %v103_v26 = vrot.slane %v102_v25, 2 }
  0xd8   :  { %v104_v27 = vadd.f32 %v103_v26, %v102_v25 }
  0xda   :  { %v105_v28 = vrot.slane %v104_v27, 1 }
  0xdc   :  { %v106_v29 = vadd.f32 %v105_v28, %v104_v27 }
  0xde   :  { %129 = vpush %v106_v29 }
 0x10f   :  { %s130_s0 = spop %129 }
 0x110   :  { %s110_s1 = smul.f32 0.125, %s130_s0 }
 0x112   :  { %112 = sst [smem:[#allocation8]] %s110_s1 }
 0x113   :  { %120 = dma.smem_to_hbm %s194_s20, 16, %s221_s2, [#allocation5]  }
 0x114   :  { %190 = dma.done.wait [#allocation5], 16  }
 0x115   :  { %191 = vsyncadd [#allocation5], 4294967280 }
 0x116   :  { %124 = sfence }
 0x117   :  { %125 = vsyncpa [#allocation4], 1 }
 0x118   :  { %126 = vsyncpa [#allocation7], 1 }
 0x119   :  { %127 = vsyncpa [#allocation5], 1 }

</bundles_post_ra>
